<compile_context>
chip_gen: v7x
topology: tpu7x:2x2x1
jax: 0.10.0
libtpu: 0.0.40
codegen_flags: <defaults>
</compile_context>

<pallas_src>
import functools

import jax
import jax.numpy as jnp
import numpy as np
from jax.experimental import pallas as pl
from jax.experimental.pallas import tpu as pltpu

# Hard-concrete constants (standard L0-reg values) and layer hyper-params.
LIMIT_A = -0.1
LIMIT_B = 1.1
EPS = 1e-6
TEMPERATURE = 2.0 / 3.0
DROPRATE_INIT = 0.5

_LANE = 128


def _l0_conv_kernel(w_ref, p_ref, z_ref, zb_ref, o_ref):
    """One (batch, spatial-tile) grid step of the transposed im2col GEMM.

    w_ref : (Cout, K)   flattened conv weight, bf16 (constant index_map -> resident)
    p_ref : (K, ts)     im2col patches tile for this batch element, bf16
    z_ref : (Cout, 1)   hard-concrete gate medians, f32
    zb_ref: (Cout, 1)   gated bias z * b, f32
    o_ref : (Cout, ts)  output tile (lane-dense along Ho*Wo)
    """
    acc = jnp.dot(w_ref[...], p_ref[...], preferred_element_type=jnp.float32)
    # Gate folded into the epilogue: (P @ (W*z)) == (P @ W) * z.
    o_ref[...] = (acc * z_ref[...] + zb_ref[...]).astype(o_ref.dtype)


def l0_conv2d_forward(x, weight, bias, weight_log_alpha, *, stride=1, padding=0,
                      tile_s=512, compute_dtype=jnp.bfloat16):
    """x: [N, Cin, H, W] (NCHW).  weight: [Cout, Cin, kh, kw].  Returns NCHW."""
    N, Cin, H, W = x.shape
    Cout, Cin_w, kh, kw = weight.shape
    assert Cin_w == Cin  # TODO(synk): groups != 1 and dilation != 1 not supported.

    Ho = (H + 2 * padding - kh) // stride + 1
    Wo = (W + 2 * padding - kw) // stride + 1
    K = Cin * kh * kw
    S = Ho * Wo

    # ---- grid-invariant gate math: done once here, not per kernel step ----
    if bias is None:
        bias = jnp.zeros((Cout,), jnp.float32)
    z = jax.nn.sigmoid(weight_log_alpha.astype(jnp.float32) / TEMPERATURE)
    z = jnp.clip(z * (LIMIT_B - LIMIT_A) + LIMIT_A, 0.0, 1.0)          # (Cout,)
    z_col = z.reshape(Cout, 1)
    zb_col = (z * bias.astype(jnp.float32)).reshape(Cout, 1)

    # ---- im2col, layout-free (no transposes): patches[n] is (K, Ho*Wo) ----
    xp = jnp.pad(x, ((0, 0), (0, 0), (padding, padding), (padding, padding)))
    cols = []
    for i in range(kh):
        for j in range(kw):
            cols.append(xp[:, :, i:i + Ho * stride:stride, j:j + Wo * stride:stride])
    # (N, Cin, kh*kw, Ho, Wo) -> (N, K, S); (cin, kh, kw) order matches weight.reshape.
    patches = jnp.stack(cols, axis=2).reshape(N, K, S)
    # TODO(synk): for large layers move patch extraction inside the kernel (DMA
    # (Cin, h_slab, W) strips) to avoid the kh*kw x im2col HBM read amplification,
    # and add a K-reduction grid axis ("arbitrary", f32 VMEM accumulator) when
    # Cin*kh*kw no longer fits alongside a big spatial tile in VMEM.

    # Lane-dense spatial tiling: pad Ho*Wo up to a multiple of the (128-aligned) tile.
    ts = max(_LANE, (min(tile_s, -(-S // _LANE) * _LANE) // _LANE) * _LANE)
    S_pad = -(-S // ts) * ts
    if S_pad != S:
        patches = jnp.pad(patches, ((0, 0), (0, 0), (0, S_pad - S)))

    # bf16 tiles feeding the MXU; accumulation stays f32 inside the kernel.
    patches_c = patches.astype(compute_dtype)
    w_flat = weight.reshape(Cout, K).astype(compute_dtype)

    in_itemsize = jnp.dtype(compute_dtype).itemsize
    out_itemsize = jnp.dtype(x.dtype).itemsize
    # VMEM budget: double-buffered patch tile + resident weight + double-buffered
    # output tile + tiny gate vectors.  Capped below v7x's 64 MiB physical VMEM.
    vmem_need = (2 * K * ts * in_itemsize + Cout * K * in_itemsize
                 + 2 * Cout * ts * out_itemsize + 4 * Cout * 4)
    vmem_limit = int(min(48 * 2**20, max(32 * 2**20, 2 * vmem_need)))

    cost = pl.CostEstimate(
        flops=int(2 * N * S_pad * K * Cout),
        transcendentals=0,
        bytes_accessed=int(N * K * S_pad * in_itemsize + Cout * K * in_itemsize
                           + N * Cout * S_pad * out_itemsize + 2 * Cout * 4),
    )

    out_flat = pl.pallas_call(
        _l0_conv_kernel,
        out_shape=jax.ShapeDtypeStruct((N, Cout, S_pad), x.dtype),
        grid_spec=pltpu.PrefetchScalarGridSpec(
            num_scalar_prefetch=0,
            grid=(N, S_pad // ts),
            in_specs=[
                pl.BlockSpec((Cout, K), lambda n, s: (0, 0)),
                pl.BlockSpec((None, K, ts), lambda n, s: (n, 0, s)),
                pl.BlockSpec((Cout, 1), lambda n, s: (0, 0)),
                pl.BlockSpec((Cout, 1), lambda n, s: (0, 0)),
            ],
            out_specs=pl.BlockSpec((None, Cout, ts), lambda n, s: (n, 0, s)),
        ),
        compiler_params=pltpu.CompilerParams(
            dimension_semantics=("parallel", "parallel"),
            vmem_limit_bytes=vmem_limit),
        cost_estimate=cost,
    )(w_flat, patches_c, z_col, zb_col)

    # (N, Cout, S_pad) -> NCHW: slice off spatial padding, layout-free reshape.
    return out_flat[:, :, :S].reshape(N, Cout, Ho, Wo)


def _reference_forward(x, weight, bias, weight_log_alpha, *, stride=1, padding=0):
    """Plain-JAX f32 reference of the eval-mode L0Conv2d forward."""
    z = jax.nn.sigmoid(weight_log_alpha / TEMPERATURE) * (LIMIT_B - LIMIT_A) + LIMIT_A
    z = jnp.clip(z, 0.0, 1.0)
    w = weight * z[:, None, None, None]
    b = bias * z
    out = jax.lax.conv_general_dilated(
        x, w, window_strides=(stride, stride),
        padding=[(padding, padding), (padding, padding)],
        dimension_numbers=("NCHW", "OIHW", "NCHW"))
    return out + b[None, :, None, None]


if __name__ == "__main__":
    # Small deterministic setup consistent with L0Conv2d.__init__.
    N, Cin, H, W = 2, 4, 16, 16
    Cout, kh, kw = 8, 3, 3
    stride, padding = 1, 1

    key = jax.random.PRNGKey(0)
    k_w, k_b, k_la, k_x = jax.random.split(key, 4)

    # kaiming_normal (fan_in) for weight, then scaled by 1/(1 - droprate_init)
    fan_in = Cin * kh * kw
    w_std = (2.0 / fan_in) ** 0.5
    initial_sigmoid = 1.0 - DROPRATE_INIT
    weight = (jax.random.normal(k_w, (Cout, Cin, kh, kw), jnp.float32) * w_std
              / initial_sigmoid)
    # bias ~ N(0, 0.01), also divided by initial_sigmoid for conv layers
    bias = jax.random.normal(k_b, (Cout,), jnp.float32) * 0.01 / initial_sigmoid
    # weight_log_alpha ~ N(log((1-p)/p), 0.01) = N(0, 0.01) for p = 0.5
    gate_mean_init = float(np.log((1.0 - DROPRATE_INIT) / DROPRATE_INIT))
    weight_log_alpha = (jax.random.normal(k_la, (Cout,), jnp.float32) * 0.01
                        + gate_mean_init)

    x = jax.random.normal(k_x, (N, Cin, H, W), jnp.float32)

    fwd = jax.jit(functools.partial(l0_conv2d_forward, stride=stride,
                                    padding=padding))
    out = fwd(x, weight, bias, weight_log_alpha)
    out = jax.block_until_ready(out)

    ref = _reference_forward(x, weight, bias, weight_log_alpha,
                             stride=stride, padding=padding)
    # Tolerance loosened vs the f32 reference because patches/weight feed the
    # MXU in bf16 (accumulation is still f32).
    np.testing.assert_allclose(np.asarray(out), np.asarray(ref),
                               rtol=5e-2, atol=5e-2)

    print("KERNEL_OK")
</pallas_src>

<mosaic_0001>
module attributes {stable_mosaic.version = 11 : i64} {
  func.func @_l0_conv_kernel(%arg0: i32, %arg1: i32, %arg2: memref<8x36xbf16, #tpu.memory_space<vmem>>, %arg3: memref<1x36x256xbf16, #tpu.memory_space<vmem>>, %arg4: memref<8x1xf32, #tpu.memory_space<vmem>>, %arg5: memref<8x1xf32, #tpu.memory_space<vmem>>, %arg6: memref<1x8x256xf32, #tpu.memory_space<vmem>>) attributes {dimension_semantics = [#tpu.dimension_semantics<parallel>, #tpu.dimension_semantics<parallel>], iteration_bounds = array<i64: 2, 1>, scalar_prefetch = 0 : i64, scratch_operands = 0 : i64, tpu.core_type = #tpu.core_type<tc>, window_params = [{pipeline_mode = #tpu.pipeline_mode<synchronous>, transform_indices = @transform_0, window_bounds = array<i64: 8, 36>}, {transform_indices = @transform_1, window_bounds = array<i64: 1, 36, 256>}, {pipeline_mode = #tpu.pipeline_mode<synchronous>, transform_indices = @transform_2, window_bounds = array<i64: 8, 1>}, {pipeline_mode = #tpu.pipeline_mode<synchronous>, transform_indices = @transform_3, window_bounds = array<i64: 8, 1>}, {transform_indices = @transform_4, window_bounds = array<i64: 1, 8, 256>}]} {
    %c0 = arith.constant 0 : index
    %c0_0 = arith.constant 0 : index
    %0 = vector.load %arg2[%c0, %c0_0] : memref<8x36xbf16, #tpu.memory_space<vmem>>, vector<8x36xbf16>
    %c0_1 = arith.constant 0 : index
    %c0_2 = arith.constant 0 : index
    %c0_3 = arith.constant 0 : index
    %1 = vector.load %arg3[%c0_1, %c0_2, %c0_3] : memref<1x36x256xbf16, #tpu.memory_space<vmem>>, vector<1x36x256xbf16>
    %2 = vector.shape_cast %1 : vector<1x36x256xbf16> to vector<36x256xbf16>
    %cst = arith.constant dense<0.000000e+00> : vector<8x256xf32>
    %3 = tpu.matmul %0, %2, %cst {dimension_numbers = #tpu.dot_dimension_numbers<[1], [0], [0], [1], [0, 0, 1, 1], [], []>} : vector<8x36xbf16>, vector<36x256xbf16>, vector<8x256xf32> -> vector<8x256xf32>
    %c0_4 = arith.constant 0 : index
    %c0_5 = arith.constant 0 : index
    %4 = vector.load %arg4[%c0_4, %c0_5] : memref<8x1xf32, #tpu.memory_space<vmem>>, vector<8x1xf32>
    %5 = vector.broadcast %4 : vector<8x1xf32> to vector<8x256xf32>
    %6 = arith.mulf %3, %5 : vector<8x256xf32>
    %c0_6 = arith.constant 0 : index
    %c0_7 = arith.constant 0 : index
    %7 = vector.load %arg5[%c0_6, %c0_7] : memref<8x1xf32, #tpu.memory_space<vmem>>, vector<8x1xf32>
    %8 = vector.broadcast %7 : vector<8x1xf32> to vector<8x256xf32>
    %9 = arith.addf %6, %8 : vector<8x256xf32>
    %c0_8 = arith.constant 0 : index
    %c0_9 = arith.constant 0 : index
    %c0_10 = arith.constant 0 : index
    %10 = vector.load %arg6[%c0_8, %c0_9, %c0_10] : memref<1x8x256xf32, #tpu.memory_space<vmem>>, vector<1x8x256xf32>
    %11 = vector.shape_cast %10 : vector<1x8x256xf32> to vector<8x256xf32>
    %12 = vector.shape_cast %9 : vector<8x256xf32> to vector<1x8x256xf32>
    tpu.vector_store %arg6[%c0_8, %c0_9, %c0_10], %12 {strides = array<i32>} : memref<1x8x256xf32, #tpu.memory_space<vmem>>, vector<1x8x256xf32>,
    return
  }
  func.func @transform_0(%arg0: i32, %arg1: i32) -> (i32, i32) {
    %c0_i32 = arith.constant 0 : i32
    %c0_i32_0 = arith.constant 0 : i32
    %c0_i32_1 = arith.constant 0 : i32
    return %c0_i32, %c0_i32_0 : i32, i32
  }
  func.func @transform_1(%arg0: i32, %arg1: i32) -> (i32, i32, i32) {
    %c0_i32 = arith.constant 0 : i32
    %c0_i32_0 = arith.constant 0 : i32
    return %arg0, %c0_i32, %arg1 : i32, i32, i32
  }
  func.func @transform_2(%arg0: i32, %arg1: i32) -> (i32, i32) {
    %c0_i32 = arith.constant 0 : i32
    %c0_i32_0 = arith.constant 0 : i32
    %c0_i32_1 = arith.constant 0 : i32
    return %c0_i32, %c0_i32_0 : i32, i32
  }
  func.func @transform_3(%arg0: i32, %arg1: i32) -> (i32, i32) {
    %c0_i32 = arith.constant 0 : i32
    %c0_i32_0 = arith.constant 0 : i32
    %c0_i32_1 = arith.constant 0 : i32
    return %c0_i32, %c0_i32_0 : i32, i32
  }
  func.func @transform_4(%arg0: i32, %arg1: i32) -> (i32, i32, i32) {
    %c0_i32 = arith.constant 0 : i32
    %c0_i32_0 = arith.constant 0 : i32
    return %arg0, %c0_i32, %arg1 : i32, i32, i32
  }
}

</mosaic_0001>

<bundles_post_ra>
// kernel: l0_conv2d_forward.1
= control target key start
LH: loop header
LB: loop body
LE: loop exit
PB: predicated region body
PF: predicated region fallthrough
CT: control target
= control target key end

     0   :  { %s530_s15 = smov 0   ;;  %s532_s16 = smov 0   ;;  %s576_s0 = inlined_call_operand.vmem [shape: bf16[8,36], index: 0, kind: input, shape index: {}]   ;;  %s577_s1 = inlined_call_operand.vmem [shape: bf16[2,36,256], index: 1, kind: input, shape index: {}]   ;;  %s578_s2 = inlined_call_operand.vmem [shape: f32[8,1], index: 2, kind: input, shape index: {}]   ;;  %s579_s3 = inlined_call_operand.vmem [shape: f32[8,1], index: 3, kind: input, shape index: {}]   ;;  %s580_s4 = inlined_call_operand.vmem [shape: f32[2,8,256], index: 4, kind: output, shape index: {}]  }
   0x1   :  { %s534_s17 = smov 0  }
   0x2 LB: > { %s26_s18 = sadd.s32 1, %s498_s16  ;;  %p430_p0 = scmp.ge.s32.totalorder %s502_s17, 1  ;;  %s502_s17 = sphi %s534_s17, %s14_s17   ;;  %s498_s16 = sphi %s532_s16, %s582_s16   ;;  %s494_s15 = sphi %s530_s15, %s581_s15  }
   0x3   : > { %p28_p1 = scmp.ge.s32.totalorder %s26_s18, 2  ;;  %p183_p2 = scmp.lt.s32.totalorder %s502_s17, 3 }
   0x5   : > { %s584_s18 = smov (%p28_p1, %s26_s18), 0  ;;  %p184_p3 = pnand %p430_p0, %p183_p2 }
   0x6   : > { %p218_p4 = scmp.lt.s32.totalorder (!%p184_p3), %s494_s15, 1  ;;  %v504_v0 = vmov (!%p184_p3), 0   ;;  %v321_v1 = vld [vmem:[%s578_s2] sm:$0xff] (!%p184_p3)  ;;  %vm273_vm0 = vcmask (!%p184_p3), 1041408   ;;  %vm269_vm1 = vcmask (!%p184_p3), 293888  }
   0x7   : > { %187 = sbr.rel (%p184_p3) target bundleno = 249 (0xf9), region = 36  ;;  %312 = vmatprep.mubr.bf16.mxu0 (!%p184_p3), %v504_v0  ;;  %471 = vset.pattern.permute.xlu0 (!%p184_p3), %v504_v0  ;;  %v329_v2 = vld [vmem:[%s579_s3] sm:$0xff] (!%p184_p3) }
   0x8   : > { %324 = vperm.xlu0 (!%p184_p3), %471, %v321_v1   ;;  %v238_v11 = vld [vmem:[%s576_s0] sm:$0xf] (!%p184_p3) }
   0xc   : > { %332 = vperm.xlu0 (!%p184_p3), %471, %v329_v2  }
   0xe   : > { %s586_s15 = smov (!%p218_p4, %s494_s15), 1 }
   0xf   : > { %s445_s23 = smul.u32 40, %s586_s15  ;;  %s444_s29 = sshll.u32 %s586_s15, 4 }
  0x10   : > { %s235_s6 = scalar_lea.vmem %s580_s4, %s444_s29 }
  0x11   : > { %s225_s26 = scalar_lea.vmem %s577_s1, %s445_s23 }
  0x12   : > { %v472_v3 = vld [vmem:[%s225_s26 + $0x4] ss:$8 sps:$4 sm:$0xff]   ;;  %v474_v4 = vld [vmem:[%s225_s26] ss:$8 sps:$4 sm:$0xff]   ;;  %v475_v5 = vld [vmem:[%s225_s26 + $0x14] ss:$8 sps:$4 sm:$0xff]  }
  0x13   : > { %280 = vmatprep.subr.bf16.mxu0 %v472_v3  ;;  %v243_v6 = vld [vmem:[%s225_s26 + $0x20] sm:$0x33]  ;;  %v477_v7 = vld [vmem:[%s225_s26 + $0x10] ss:$8 sps:$4 sm:$0xff]  }
  0x14   : > { %281 = vmatpush1.bf16.msra.mxu0 %v474_v4  ;;  %v439_v8 = vcombine.high %v243_v6, %v243_v6  ;;  %v438_v9 = vcombine.low %v243_v6, %v243_v6 }
  0x15   : > { %282 = vmatprep.subr.bf16.mxu0 %v475_v5 }
  0x16   : > { %v275_v10 = vsel %vm273_vm0, %v438_v9, 0 }
  0x18   : > { %283 = vmatpush1.bf16.msra.mxu0 %v477_v7 }
  0x19   : > { %440 = vmatprep.subr.msk.bf16.mxu0 %vm273_vm0, %v439_v8 }
  0x1c   : > { %285 = vmatpush1.bf16.msra.mxu0 %v275_v10 }
  0x1f   : > { %441 = vmatmul.mubr.msk.bf16.vlgmr.msra.gmra.mrb[0].mxu0 %vm269_vm1, %v238_v11 }
  0x87   : > { %v325_v12 = vpop.permute.xlu0 %324 }
  0x8b   : > { %v333_v16 = vpop.permute.xlu0 %332 }
  0xf2   : > { %v314_v13 = vpop.f32.mrb[0].mxu0 }
  0xf3   : > { %v327_v14 = vmul.f32 %v325_v12, %v314_v13  ;;  %v316_v15 = vpop.f32.mrb[1].mxu0 }
  0xf4   : > { %v328_v17 = vmul.f32 %v325_v12, %v316_v15  ;;  %v318_v18 = vpop.f32.mrb[2].mxu0 }
  0xf5   : > { %v335_v19 = vadd.f32 %v333_v16, %v327_v14  ;;  %v319_v20 = vpop.f32.mrb[3].mxu0 }
  0xf6   : > { %v336_v21 = vadd.f32 %v333_v16, %v328_v17 }
  0xf7   : > { %337 = vst [vmem:[%s235_s6] sm:$0xff] %v335_v19 }
  0xf8   : > { %338 = vst [vmem:[%s235_s6 + $0x8] sm:$0xff] %v336_v21 }
  0xf9 PF: > { %s14_s17 = sadd.s32 1, %s502_s17   ;;  %s581_s15 = smov %s498_s16 }
  0xfa   : > { %p11_p5 = scmp.ge.s32.totalorder %s14_s17, 4   ;;  %s582_s16 = smov %s584_s18 }
  0xfc   :  { %13 = sbr.rel (!%p11_p5) target bundleno = 2 (0x2), region = 66 }

</bundles_post_ra>
